<compile_context>
chip_gen: v7x
topology: tpu7x:2x2x1
jax: 0.10.0
libtpu: 0.0.40
codegen_flags: <defaults>
</compile_context>

<pallas_src>
import functools

import jax
import jax.numpy as jnp
from jax.experimental import pallas as pl
from jax.experimental.pallas import tpu as pltpu

BN_EPS = 1e-5
LANE = 128
SUBLANE = 8


def _round_up(x, m):
    return ((x + m - 1) // m) * m


# ---------------------------------------------------------------------------
# Pass 1: per-column sum(h) / sum(h*h).
# Grid (2, tiles_per_half); each p accumulates into its own (1, H_pad) f32 block
# that stays VMEM-resident across the 'arbitrary' inner axis.
# ---------------------------------------------------------------------------
def _stats_kernel(x_ref, w1t_ref, sum_ref, sumsq_ref, *,
                  n_rows, tile_n, tiles_per_half):
    p = pl.program_id(0)
    i = pl.program_id(1)

    @pl.when(i == 0)
    def _():
        sum_ref[...] = jnp.zeros_like(sum_ref)
        sumsq_ref[...] = jnp.zeros_like(sumsq_ref)

    # Mask rows outside the real (unpadded) input: the partial tail tile and, for odd
    # tile counts, the duplicated clamped block of the second half.  Masked rows are
    # zeroed and therefore contribute exactly nothing to either statistic.
    row_start = (p * tiles_per_half + i) * tile_n
    row_ids = jax.lax.broadcasted_iota(jnp.int32, (tile_n, 1), 0) + row_start
    x = jnp.where(row_ids < n_rows, x_ref[...], 0.0).astype(jnp.bfloat16)

    # bf16 MXU matmul, f32 accumulation.  b1 is dropped on purpose: it cancels exactly
    # under train-mode BatchNorm (shifts the mean, leaves h - mean and var unchanged).
    h = jnp.dot(x, w1t_ref[...], preferred_element_type=jnp.float32)
    sum_ref[...] += jnp.sum(h, axis=0, keepdims=True)
    sumsq_ref[...] += jnp.sum(h * h, axis=0, keepdims=True)


# ---------------------------------------------------------------------------
# Pass 2: folded BN affine + ReLU + Linear2 per independent row tile.
# ---------------------------------------------------------------------------
def _apply_kernel(x_ref, w1t_ref, scale_ref, shift_ref, w2t_ref, b2_ref, o_ref):
    x = x_ref[...].astype(jnp.bfloat16)
    h = jnp.dot(x, w1t_ref[...], preferred_element_type=jnp.float32)
    h_act = jnp.maximum(h * scale_ref[...] + shift_ref[...], 0.0).astype(jnp.bfloat16)
    out = jnp.dot(h_act, w2t_ref[...], preferred_element_type=jnp.float32) + b2_ref[...]
    o_ref[...] = out.astype(o_ref.dtype)


# ---------------------------------------------------------------------------
# One-time parameter prep (outside the hot path): transpose to (in, out), zero-pad the
# hidden axis to the 128-lane width (numerically inert: gamma/beta pads are 0 so the
# padded columns stay 0 through BN/ReLU and the zero rows of W2^T), cast matmul
# operands to bf16.  NOTE: b1 is intentionally dropped (cancels under train-mode BN).
# ---------------------------------------------------------------------------
def prepare_params(params, embedding_size, projection_hidden_size):
    c, h = embedding_size, projection_hidden_size
    h_pad = _round_up(h, LANE)
    w1t = jnp.zeros((c, h_pad), jnp.float32).at[:, :h].set(params["w1"].T)
    w2t = jnp.zeros((h_pad, c), jnp.float32).at[:h, :].set(params["w2"].T)
    gamma = jnp.zeros((1, h_pad), jnp.float32).at[0, :h].set(params["gamma"])
    beta = jnp.zeros((1, h_pad), jnp.float32).at[0, :h].set(params["beta"])
    b2 = params["b2"].astype(jnp.float32).reshape(1, c)
    return {
        "w1t": w1t.astype(jnp.bfloat16),
        "w2t": w2t.astype(jnp.bfloat16),
        "gamma": gamma,
        "beta": beta,
        "b2": b2,
        "c": c,
        "h": h,
        "h_pad": h_pad,
    }


def mlp_head_forward(x, prep, *, tile_n=4096):
    """x: (B, L, C) float32 -> (B, L, C) float32 (training-mode BatchNorm forward)."""
    b, l, c = x.shape
    assert c == prep["c"]
    n = b * l
    h_pad = prep["h_pad"]

    x2d = x.reshape(n, c)  # metadata-only reshape; no HBM copy, no padding, no cast

    # Row tiling: multiple of 8 sublanes, 2-4K rows to amortize the ~0.35us/step fixed
    # cost, clamped so small N still produces >= 2 tiles (keeps both v7x cores busy).
    tile_n = max(SUBLANE, min(tile_n, _round_up(pl.cdiv(n, 2), SUBLANE)))
    num_tiles = pl.cdiv(n, tile_n)
    tiles_per_half = pl.cdiv(num_tiles, 2)
    last_blk = num_tiles - 1

    vmem_limit = 32 * 1024 * 1024  # few-MiB live set; ample headroom on v5e/v6e/v7x

    # ---- Pass 1: batch statistics, split across 2 cores ('parallel') x tiles ('arbitrary')
    stats_cost = pl.CostEstimate(
        flops=2 * n * c * h_pad + 3 * n * h_pad,
        transcendentals=0,
        bytes_accessed=n * c * 4 + c * h_pad * 2 + 4 * h_pad * 4,
    )
    stat_spec = pl.BlockSpec((None, 1, h_pad), lambda p, i: (p, 0, 0))
    col_sum, col_sumsq = pl.pallas_call(
        functools.partial(_stats_kernel, n_rows=n, tile_n=tile_n,
                          tiles_per_half=tiles_per_half),
        out_shape=(jax.ShapeDtypeStruct((2, 1, h_pad), jnp.float32),
                   jax.ShapeDtypeStruct((2, 1, h_pad), jnp.float32)),
        grid=(2, tiles_per_half),
        in_specs=[
            # Clamp the block index so the duplicated step of an odd tile count never DMAs
            # out of bounds; its contribution is row-masked away inside the kernel.
            pl.BlockSpec(
                (tile_n, c),
                lambda p, i: (jnp.minimum(p * tiles_per_half + i, last_blk), 0)),
            pl.BlockSpec((c, h_pad), lambda p, i: (0, 0)),        # W1^T resident
        ],
        out_specs=(stat_spec, stat_spec),
        compiler_params=pltpu.CompilerParams(
            dimension_semantics=("parallel", "arbitrary"),
            vmem_limit_bytes=vmem_limit,
        ),
        cost_estimate=stats_cost,
    )(x2d, prep["w1t"])

    # ---- Glue: combine halves and fold BN once (tiny (1, H_pad) ops, hoisted out of pass 2)
    col_sum = jnp.sum(col_sum, axis=0)       # (1, h_pad)
    col_sumsq = jnp.sum(col_sumsq, axis=0)   # (1, h_pad)
    mean = col_sum / n
    # One-pass moments in f32; clamp var >= 0 against cancellation when |mean| >> sigma.
    var = jnp.maximum(col_sumsq / n - mean * mean, 0.0)
    scale = prep["gamma"] * jax.lax.rsqrt(var + BN_EPS)
    shift = prep["beta"] - mean * scale

    # ---- Pass 2: BN(scale/shift) + ReLU + Linear2, independent tiles ('parallel')
    apply_cost = pl.CostEstimate(
        flops=4 * n * c * h_pad + 4 * n * h_pad + n * c,
        transcendentals=0,
        bytes_accessed=2 * n * c * 4 + 2 * c * h_pad * 2 + (2 * h_pad + c) * 4,
    )
    out2d = pl.pallas_call(
        _apply_kernel,
        out_shape=jax.ShapeDtypeStruct((n, c), x.dtype),
        grid=(num_tiles,),
        in_specs=[
            pl.BlockSpec((tile_n, c), lambda i: (i, 0)),          # x tile (f32, unpadded)
            pl.BlockSpec((c, h_pad), lambda i: (0, 0)),           # W1^T resident
            pl.BlockSpec((1, h_pad), lambda i: (0, 0)),           # folded BN scale
            pl.BlockSpec((1, h_pad), lambda i: (0, 0)),           # folded BN shift
            pl.BlockSpec((h_pad, c), lambda i: (0, 0)),           # W2^T resident
            pl.BlockSpec((1, c), lambda i: (0, 0)),               # b2
        ],
        out_specs=pl.BlockSpec((tile_n, c), lambda i: (i, 0)),    # exact (N, C) writeback
        compiler_params=pltpu.CompilerParams(
            dimension_semantics=("parallel",),
            vmem_limit_bytes=vmem_limit,
        ),
        cost_estimate=apply_cost,
    )(x2d, prep["w1t"], scale, shift, prep["w2t"], prep["b2"])

    return out2d.reshape(b, l, c)


def init_params(key, embedding_size, projection_hidden_size):
    """Deterministic synthetic parameters matching MLPHead's layer shapes."""
    k1, k2, k3, k4 = jax.random.split(key, 4)
    c, h = embedding_size, projection_hidden_size
    lim1 = 1.0 / jnp.sqrt(c)
    lim2 = 1.0 / jnp.sqrt(h)
    return {
        "w1": jax.random.uniform(k1, (h, c), jnp.float32, -lim1, lim1),
        "b1": jax.random.uniform(k2, (h,), jnp.float32, -lim1, lim1),  # used by the reference only
        "gamma": jnp.ones((h,), jnp.float32),   # BatchNorm1d weight
        "beta": jnp.zeros((h,), jnp.float32),   # BatchNorm1d bias
        "w2": jax.random.uniform(k3, (c, h), jnp.float32, -lim2, lim2),
        "b2": jax.random.uniform(k4, (c,), jnp.float32, -lim2, lim2),
    }


def reference_forward(x, params):
    """Pure-JAX f32 reference mirroring the PyTorch forward (training-mode BN, includes b1)."""
    b, l, c = x.shape
    x2d = x.reshape(-1, c)
    h = x2d @ params["w1"].T + params["b1"]
    mean = h.mean(axis=0, keepdims=True)
    var = ((h - mean) ** 2).mean(axis=0, keepdims=True)
    h = (h - mean) / jnp.sqrt(var + BN_EPS) * params["gamma"] + params["beta"]
    h = jnp.maximum(h, 0.0)
    out = h @ params["w2"].T + params["b2"]
    return out.reshape(b, l, c)


if __name__ == "__main__":
    B, L = 2, 8
    EMBEDDING_SIZE = 32          # cfg.MODEL.EMBEDDER_MODEL.EMBEDDING_SIZE
    PROJECTION_SIZE = 64         # cfg.MODEL.PROJECTION_SIZE

    key = jax.random.PRNGKey(0)
    kx, kp, kx2 = jax.random.split(key, 3)
    params = init_params(kp, EMBEDDING_SIZE, PROJECTION_SIZE)
    prep = prepare_params(params, EMBEDDING_SIZE, PROJECTION_SIZE)  # one-time weight prep

    # Primary check at the module's small shape (2 row tiles -> both v7x cores exercised).
    x = jax.random.normal(kx, (B, L, EMBEDDING_SIZE), jnp.float32)
    out = jax.block_until_ready(mlp_head_forward(x, prep))
    ref = reference_forward(x, params)
    assert out.shape == (B, L, EMBEDDING_SIZE)
    max_err = float(jnp.max(jnp.abs(out - ref)))
    # bf16 MXU operands (f32 accumulation / BN math) vs pure-f32 reference -> relaxed tolerance.
    assert jnp.allclose(out, ref, atol=7.5e-2, rtol=5e-2), f"mismatch vs reference, max abs err={max_err}"

    # Secondary check: multi-tile accumulation, odd tile count (clamped+masked duplicate block)
    # and a partial tail tile.
    x2 = jax.random.normal(kx2, (3, 70, EMBEDDING_SIZE), jnp.float32)
    out2 = jax.block_until_ready(mlp_head_forward(x2, prep, tile_n=32))
    ref2 = reference_forward(x2, params)
    max_err2 = float(jnp.max(jnp.abs(out2 - ref2)))
    assert jnp.allclose(out2, ref2, atol=7.5e-2, rtol=5e-2), f"mismatch vs reference, max abs err={max_err2}"

    print("KERNEL_OK")
</pallas_src>

<mosaic_0001>
module attributes {stable_mosaic.version = 11 : i64} {
  func.func @_stats_kernel(%arg0: i32, %arg1: i32, %arg2: memref<8x32xf32, #tpu.memory_space<vmem>>, %arg3: memref<32x128xbf16, #tpu.memory_space<vmem>>, %arg4: memref<1x1x128xf32, #tpu.memory_space<vmem>>, %arg5: memref<1x1x128xf32, #tpu.memory_space<vmem>>) attributes {dimension_semantics = [#tpu.dimension_semantics<parallel>, #tpu.dimension_semantics<arbitrary>], iteration_bounds = array<i64: 2, 1>, scalar_prefetch = 0 : i64, scratch_operands = 0 : i64, tpu.core_type = #tpu.core_type<tc>, window_params = [{transform_indices = @transform_0, window_bounds = array<i64: 8, 32>}, {pipeline_mode = #tpu.pipeline_mode<synchronous>, transform_indices = @transform_1, window_bounds = array<i64: 32, 128>}, {transform_indices = @transform_2, window_bounds = array<i64: 1, 1, 128>}, {transform_indices = @transform_3, window_bounds = array<i64: 1, 1, 128>}]} {
    %c0_i32 = arith.constant 0 : i32
    %0 = arith.cmpi eq, %arg1, %c0_i32 : i32
    %1 = arith.extui %0 : i1 to i32
    %c0_i32_0 = arith.constant 0 : i32
    %2 = arith.cmpi ne, %1, %c0_i32_0 : i32
    scf.if %2 {
      %cst_19 = arith.constant 0.000000e+00 : f32
      %36 = vector.broadcast %cst_19 : f32 to vector<1x128xf32>
      %c0_20 = arith.constant 0 : index
      %c0_21 = arith.constant 0 : index
      %c0_22 = arith.constant 0 : index
      %37 = vector.load %arg4[%c0_20, %c0_21, %c0_22] : memref<1x1x128xf32, #tpu.memory_space<vmem>>, vector<1x1x128xf32>
      %38 = vector.shape_cast %37 : vector<1x1x128xf32> to vector<1x128xf32>
      %39 = vector.shape_cast %36 : vector<1x128xf32> to vector<1x1x128xf32>
      tpu.vector_store %arg4[%c0_20, %c0_21, %c0_22], %39 {strides = array<i32>} : memref<1x1x128xf32, #tpu.memory_space<vmem>>, vector<1x1x128xf32>,
      %cst_23 = arith.constant 0.000000e+00 : f32
      %40 = vector.broadcast %cst_23 : f32 to vector<1x128xf32>
      %c0_24 = arith.constant 0 : index
      %c0_25 = arith.constant 0 : index
      %c0_26 = arith.constant 0 : index
      %41 = vector.load %arg5[%c0_24, %c0_25, %c0_26] : memref<1x1x128xf32, #tpu.memory_space<vmem>>, vector<1x1x128xf32>
      %42 = vector.shape_cast %41 : vector<1x1x128xf32> to vector<1x128xf32>
      %43 = vector.shape_cast %40 : vector<1x128xf32> to vector<1x1x128xf32>
      tpu.vector_store %arg5[%c0_24, %c0_25, %c0_26], %43 {strides = array<i32>} : memref<1x1x128xf32, #tpu.memory_space<vmem>>, vector<1x1x128xf32>,
    } else {
    }
    %c1_i32 = arith.constant 1 : i32
    %3 = arith.muli %arg0, %c1_i32 : i32
    %4 = arith.addi %3, %arg1 : i32
    %c8_i32 = arith.constant 8 : i32
    %5 = arith.muli %4, %c8_i32 : i32
    %6 = tpu.iota {dimensions = array<i32: 0>} : vector<8x1xi32>
    %7 = vector.broadcast %5 : i32 to vector<8x1xi32>
    %8 = arith.addi %6, %7 : vector<8x1xi32>
    %c16_i32 = arith.constant 16 : i32
    %9 = vector.broadcast %c16_i32 : i32 to vector<8x1xi32>
    %10 = arith.cmpi slt, %8, %9 : vector<8x1xi32>
    %c0 = arith.constant 0 : index
    %c0_1 = arith.constant 0 : index
    %11 = vector.load %arg2[%c0, %c0_1] : memref<8x32xf32, #tpu.memory_space<vmem>>, vector<8x32xf32>
    %cst = arith.constant 0.000000e+00 : f32
    %12 = vector.shape_cast %10 : vector<8x1xi1> to vector<8x1xi1>
    %13 = vector.broadcast %12 : vector<8x1xi1> to vector<8x32xi1>
    %14 = vector.broadcast %cst : f32 to vector<8x32xf32>
    %15 = arith.select %13, %11, %14 : vector<8x32xi1>, vector<8x32xf32>
    %16 = arith.truncf %15 : vector<8x32xf32> to vector<8x32xbf16>
    %c0_2 = arith.constant 0 : index
    %c0_3 = arith.constant 0 : index
    %17 = vector.load %arg3[%c0_2, %c0_3] : memref<32x128xbf16, #tpu.memory_space<vmem>>, vector<32x128xbf16>
    %cst_4 = arith.constant dense<0.000000e+00> : vector<8x128xf32>
    %18 = tpu.matmul %16, %17, %cst_4 {dimension_numbers = #tpu.dot_dimension_numbers<[1], [0], [0], [1], [0, 0, 1, 1], [], []>} : vector<8x32xbf16>, vector<32x128xbf16>, vector<8x128xf32> -> vector<8x128xf32>
    %c0_5 = arith.constant 0 : index
    %c0_6 = arith.constant 0 : index
    %c0_7 = arith.constant 0 : index
    %19 = vector.load %arg4[%c0_5, %c0_6, %c0_7] : memref<1x1x128xf32, #tpu.memory_space<vmem>>, vector<1x1x128xf32>
    %20 = vector.shape_cast %19 : vector<1x1x128xf32> to vector<1x128xf32>
    %cst_8 = arith.constant dense<0.000000e+00> : vector<128xf32>
    %21 = vector.multi_reduction <add>, %18, %cst_8 [0] : vector<8x128xf32> to vector<128xf32>
    %22 = vector.shape_cast %21 : vector<128xf32> to vector<1x128xf32>
    %23 = arith.addf %20, %22 : vector<1x128xf32>
    %c0_9 = arith.constant 0 : index
    %c0_10 = arith.constant 0 : index
    %c0_11 = arith.constant 0 : index
    %24 = vector.load %arg4[%c0_9, %c0_10, %c0_11] : memref<1x1x128xf32, #tpu.memory_space<vmem>>, vector<1x1x128xf32>
    %25 = vector.shape_cast %24 : vector<1x1x128xf32> to vector<1x128xf32>
    %26 = vector.shape_cast %23 : vector<1x128xf32> to vector<1x1x128xf32>
    tpu.vector_store %arg4[%c0_9, %c0_10, %c0_11], %26 {strides = array<i32>} : memref<1x1x128xf32, #tpu.memory_space<vmem>>, vector<1x1x128xf32>,
    %c0_12 = arith.constant 0 : index
    %c0_13 = arith.constant 0 : index
    %c0_14 = arith.constant 0 : index
    %27 = vector.load %arg5[%c0_12, %c0_13, %c0_14] : memref<1x1x128xf32, #tpu.memory_space<vmem>>, vector<1x1x128xf32>
    %28 = vector.shape_cast %27 : vector<1x1x128xf32> to vector<1x128xf32>
    %29 = arith.mulf %18, %18 : vector<8x128xf32>
    %cst_15 = arith.constant dense<0.000000e+00> : vector<128xf32>
    %30 = vector.multi_reduction <add>, %29, %cst_15 [0] : vector<8x128xf32> to vector<128xf32>
    %31 = vector.shape_cast %30 : vector<128xf32> to vector<1x128xf32>
    %32 = arith.addf %28, %31 : vector<1x128xf32>
    %c0_16 = arith.constant 0 : index
    %c0_17 = arith.constant 0 : index
    %c0_18 = arith.constant 0 : index
    %33 = vector.load %arg5[%c0_16, %c0_17, %c0_18] : memref<1x1x128xf32, #tpu.memory_space<vmem>>, vector<1x1x128xf32>
    %34 = vector.shape_cast %33 : vector<1x1x128xf32> to vector<1x128xf32>
    %35 = vector.shape_cast %32 : vector<1x128xf32> to vector<1x1x128xf32>
    tpu.vector_store %arg5[%c0_16, %c0_17, %c0_18], %35 {strides = array<i32>} : memref<1x1x128xf32, #tpu.memory_space<vmem>>, vector<1x1x128xf32>,
    return
  }
  func.func @transform_0(%arg0: i32, %arg1: i32) -> (i32, i32) {
    %c1_i32 = arith.constant 1 : i32
    %0 = arith.muli %arg0, %c1_i32 : i32
    %1 = arith.addi %0, %arg1 : i32
    %c1_i32_0 = arith.constant 1 : i32
    %2 = arith.minsi %1, %c1_i32_0 : i32
    %c0_i32 = arith.constant 0 : i32
    %c0_i32_1 = arith.constant 0 : i32
    return %2, %c0_i32 : i32, i32
  }
  func.func @transform_1(%arg0: i32, %arg1: i32) -> (i32, i32) {
    %c0_i32 = arith.constant 0 : i32
    %c0_i32_0 = arith.constant 0 : i32
    %c0_i32_1 = arith.constant 0 : i32
    return %c0_i32, %c0_i32_0 : i32, i32
  }
  func.func @transform_2(%arg0: i32, %arg1: i32) -> (i32, i32, i32) {
    %c0_i32 = arith.constant 0 : i32
    %c0_i32_0 = arith.constant 0 : i32
    %c0_i32_1 = arith.constant 0 : i32
    return %arg0, %c0_i32, %c0_i32_0 : i32, i32, i32
  }
  func.func @transform_3(%arg0: i32, %arg1: i32) -> (i32, i32, i32) {
    %c0_i32 = arith.constant 0 : i32
    %c0_i32_0 = arith.constant 0 : i32
    %c0_i32_1 = arith.constant 0 : i32
    return %arg0, %c0_i32, %c0_i32_0 : i32, i32, i32
  }
}

</mosaic_0001>

<bundles_post_ra>
// kernel: tpu_custom_call.1
= control target key start
LH: loop header
LB: loop body
LE: loop exit
PB: predicated region body
PF: predicated region fallthrough
CT: control target
= control target key end

     0   :  { %s1124_s0 = inlined_call_operand.hbm [shape: f32[16,32], index: 0, kind: input, shape index: {}]   ;;  %s1125_s1 = inlined_call_operand.hbm [shape: bf16[32,128], index: 1, kind: input, shape index: {}]   ;;  %s1126_s2 = inlined_call_operand.hbm [shape: f32[2,1,128], index: 2, kind: output, shape index: {0}]   ;;  %s1127_s3 = inlined_call_operand.hbm [shape: f32[2,1,128], index: 3, kind: output, shape index: {1}]  }
   0x1   :  { %1135 = sst [smem:[#allocation16_spill]] %s1125_s1 }
   0x2   :  { %9 = vsyncpa [#allocation3], 0 }
   0x3   :  { %11 = vsyncpa [#allocation3 + $0x1], 0 }
   0x4   :  { %12 = vsyncpa [#allocation6], 0 }
   0x5   :  { %13 = vsyncpa [#allocation4], 0 }
   0x6   :  { %15 = vsyncpa [#allocation4 + $0x1], 0 }
   0x7   :  { %16 = vsyncpa [#allocation9], 0 }
   0x8   :  { %18 = vsyncpa [#allocation9 + $0x1], 0  ;;  %s841_s12 = smov 0   ;;  %s843_s13 = smov 0  }
   0x9   :  { %s845_s14 = smov 0   ;;  %s847_s15 = smov 0  }
   0xa   :  { %s849_s16 = smov 0   ;;  %s851_s17 = smov 0  }
   0xb   :  { %s853_s18 = smov 0   ;;  %s855_s19 = smov 0  }
   0xc   :  { %s857_s20 = smov 0  }
   0xd LB: > { %1136 = sst [smem:[#allocation14_spill]] %s807_s19  ;;  %s474_s21 = sadd.s32 4294967295, %s811_s20   ;;  %s811_s20 = sphi %s857_s20, %s24_s20   ;;  %s807_s19 = sphi %s855_s19, %s1155_s19   ;;  %s803_s18 = sphi %s853_s18, %s1154_s18   ;;  %s799_s17 = sphi %s851_s17, %s1161_s17   ;;  %s795_s16 = sphi %s849_s16, %s1160_s16   ;;  %s791_s15 = sphi %s847_s15, %s1159_s15   ;;  %s787_s14 = sphi %s845_s14, %s1158_s14   ;;  %s783_s13 = sphi %s843_s13, %s1157_s13   ;;  %s779_s12 = sphi %s841_s12, %s1156_s12  }
   0xe   : > { %s475_s22 = sadd.s32 4294967294, %s811_s20   ;;  %p62_p0 = scmp.ne.s32.totalorder %s795_s16, %s791_s15 }
   0xf   : > { %p887_p1 = scmp.eq.s32.totalorder %s474_s21, 0  ;;  %p106_p2 = scmp.ne.s32.totalorder %s787_s14, %s783_s13 }
  0x10   : > { %p107_p3 = scmp.eq.s32.totalorder %s474_s21, 1  ;;  %p112_p5 = scmp.ne.s32.totalorder %s783_s13, %s779_s12 }
  0x11   : > { %s1137_s23 = scalar_select %p887_p1, 1, 0 }
  0x12   : > { %p895_p4 = por %p887_p1, %p62_p0  ;;  %p901_p6 = por %p107_p3, %p106_p2 }
  0x13   : > { %p113_p7 = scmp.eq.s32.totalorder %s475_s22, 1  ;;  %p476_p8 = scmp.ge.s32.totalorder %s811_s20, 1 }
  0x14   : > { %s1138_s24 = scalar_select %p895_p4, 1, 0 }
  0x15   : > { %s1139_s25 = scalar_select %p901_p6, 1, 0 }
  0x16   : > { %p146_p9 = scmp.lt.s32.totalorder %s811_s20, 3  ;;  %p907_p10 = por %p113_p7, %p112_p5 }
  0x17   : > { %s813_s28 = smov [#allocation5]   ;;  %s1143_s1 = sld [smem:[#allocation16_spill]] }
  0x18   : > { %s1140_s26 = scalar_select %p907_p10, 1, 0 }
  0x19   : > { %p911_p11 = pnand %p476_p8, %p146_p9  ;;  %s158_s29 = sshll.u32 %s813_s28, 4  ;;  %s159_s29 = int_to_ptr.vmem [resolvable:$true] %s158_s29 }
  0x1b   : > { %s1141_s27 = scalar_select %p911_p11, 1, 0 }
  0x1c   : > { %p513_p12 = pneg %p911_p11 }
  0x1d   : > { %s611_s6 = scalar_lea.hbm %s1143_s1, 256 }
  0x1e   : > { %p920_p0 = pnand %p513_p12, %p887_p1  ;;  %p612_p2 = scmp.ne.s32.totalorder %s1143_s1, %s611_s6 }
  0x1f   : > { %p618_p8 = scmp.lt.u32.totalorder %s611_s6, %s1143_s1 }
  0x20   : > { %p613_p3 = pneg %p920_p0 }
  0x22   : > { %p614_p5 = pnand %p613_p3, %p612_p2 }
  0x24   : > { %p615_p7 = pneg %p614_p5 }
  0x26   : > { %p620_p9 = pnand %p618_p8, %p615_p7 }
  0x28   : > { %623 = shalt.err (!%p620_p9)
}
  0x29   : > { %s624_s11 = scalar_lea.vmem %s159_s29, 256  ;;  %p632_p6 = scmp.lt.s32.totalorder %s159_s29, %s159_s29 }
  0x2a   : > { %p625_p12 = scmp.ne.s32.totalorder %s159_s29, %s624_s11  ;;  %p633_p1 = scmp.lt.s32.totalorder %s624_s11, %s624_s11 }
  0x2c   : > { %p627_p13 = pnand %p625_p12, %p613_p3  ;;  %p634_p4 = por %p633_p1, %p632_p6 }
  0x2e   : > { %p628_p10 = pneg %p627_p13 }
  0x30   : > { %p635_p11 = pnand %p634_p4, %p628_p10 }
  0x32   : > { %638 = shalt.err (!%p635_p11)
}
  0x33   : > { %s814_s15 = smov 64   ;;  %s815_s21 = smov 4  }
  0x34   : > { %516 = dma.hbm_to_vmem [thread:$0]  (!%p920_p0), %s1143_s1, 256, %s159_s29, [#allocation6], %s814_s15, %s814_s15, %s815_s21  }
  0x35   : > { %s36_s4 = sadd.s32 1, %s807_s19  ;;  %p41_p1 = scmp.lt.s32.totalorder %s807_s19, 1 }
  0x36   : > { %p38_p4 = scmp.ge.s32.totalorder %s36_s4, 2  ;;  %s49_s5 = sadd.s32 1, %s799_s17 }
  0x37   : > { %s42_s6 = scalar_select %p41_p1, %s807_s19, 1 }
  0x38   : > { %s1163_s4 = smov (%p38_p4, %s36_s4), 0  ;;  %p56_p6 = scmp.ne.s32.totalorder %s799_s17, %s795_s16 }
  0x39   : > { %1144 = sst [smem:[#allocation15_spill]] %s1163_s4  ;;  %p57_p10 = scmp.eq.s32.totalorder %s811_s20, 0 }
  0x3a   : > { %p44_p11 = scmp.lt.s32.totalorder %s1163_s4, 1  ;;  %s93_s30 = ssub.s32 %s807_s19, %s1163_s4 }
  0x3b   : > { %p952_p13 = por %p57_p10, %p56_p6  ;;  %p94_p0 = scmp.eq.s32.totalorder %s93_s30, 0 }
  0x3c   : > { %s45_s29 = scalar_select %p44_p11, %s1163_s4, 1 }
  0x3d   : > { %s96_s8 = sadd.s32 1, %s787_s14  ;;  %p529_p2 = scmp.lt.s32.totalorder %s811_s20, 2 }
  0x3e   : > { %s46_s9 = ssub.s32 %s42_s6, %s45_s29  ;;  %s172_s10 = sand.u32 1, %s799_s17  }
  0x3f   : > { %p47_p3 = scmp.eq.s32.totalorder %s46_s9, 0  ;;  %s479_s21 = sshll.u32 %s172_s10, 3 }
  0x40   : > { %s961_s11 = scalar_select %p94_p0, %s787_s14, %s96_s8  }
  0x41   : > { %s964_s15 = scalar_select %p47_p3, %s799_s17, %s49_s5  }
  0x42   : > { %s480_s22 = sshll.u32 %s42_s6, 7  ;;  %s176_s30 = scalar_lea.vmem [#allocation2], %s479_s21 }
  0x43   : > { %s969_s19 = scalar_lea.hbm %s1124_s0, %s480_s22  ;;  %s186_s4 = sshll.u32 %s176_s30, 4  ;;  %s977_s4 = int_to_ptr.vmem [resolvable:$true] %s186_s4 }
  0x44   : > { %p973_p5 = pnand %p529_p2, %p952_p13  ;;  %s173_s5 = scalar_lea.sflag [#allocation3], %s172_s10 }
  0x45   : > { %s639_s6 = scalar_lea.hbm %s969_s19, 128  ;;  %s644_s7 = scalar_lea.hbm %s1124_s0, 256 }
  0x46   : > { %p640_p7 = scmp.ne.s32.totalorder %s969_s19, %s639_s6  ;;  %p641_p8 = pneg %p973_p5 }
  0x47   : > { %p645_p1 = scmp.lt.u32.totalorder %s969_s19, %s1124_s0  ;;  %p646_p4 = scmp.lt.u32.totalorder %s644_s7, %s639_s6 }
  0x48   : > { %p642_p9 = pnand %p641_p8, %p640_p7  ;;  %p648_p10 = scmp.lt.u32.totalorder %s639_s6, %s969_s19 }
  0x49   : > { %p647_p6 = por %p646_p4, %p645_p1 }
  0x4a   : > { %p643_p12 = pneg %p642_p9 }
  0x4b   : > { %p649_p11 = por %p648_p10, %p647_p6 }
  0x4d   : > { %p650_p13 = pnand %p649_p11, %p643_p12 }
  0x4f   : > { %653 = shalt.err (!%p650_p13)
}
  0x50   : > { %s654_s10 = scalar_lea.vmem %s977_s4, 128  ;;  %s816_s22 = smov [#allocation2]  }
  0x51   : > { %p655_p0 = scmp.ne.s32.totalorder %s977_s4, %s654_s10  ;;  %s659_s28 = sshll.u32 %s816_s22, 4  ;;  %s660_s28 = int_to_ptr.vmem [resolvable:$false] %s659_s28 }
  0x52   : > { %s661_s30 = scalar_lea.vmem %s660_s28, 256  ;;  %p662_p7 = scmp.lt.s32.totalorder %s977_s4, %s660_s28 }
  0x53   : > { %p657_p2 = pnand %p655_p0, %p641_p8  ;;  %p663_p9 = scmp.lt.s32.totalorder %s661_s30, %s654_s10 }
  0x55   : > { %p658_p3 = pneg %p657_p2  ;;  %p664_p1 = por %p663_p9, %p662_p7 }
  0x57   : > { %p665_p4 = pnand %p664_p1, %p658_p3 }
  0x59   : > { %668 = shalt.err (!%p665_p4)
}
  0x5a   : > { %520 = dma.hbm_to_vmem [thread:$0]  (!%p973_p5), %s969_s19, 128, %s977_s4, %s173_s5  }
  0x5b   : > { %p1147_p12 = scmp.ne.s32.totalorder %s1141_s27, 0 }
  0x5c   : > { %s197_s6 = sand.u32 (!%p1147_p12), 1, %s795_s16   ;;  %p1148_p8 = scmp.ne.s32.totalorder (!%p1147_p12), %s1138_s24, 0 }
  0x5d   : > { %195 = sbr.rel (%p1147_p12) target bundleno = 377 (0x179), region = 28  ;;  %s482_s1 = sshll.u32 (!%p1147_p12), %s197_s6, 3 }
  0x5e   : > { %s198_s8 = scalar_lea.sflag (!%p1147_p12), [#allocation3], %s197_s6  ;;  %s201_s7 = scalar_lea.vmem (!%p1147_p12), [#allocation2], %s482_s1 }
  0x64   : > { %762 = dma.done.wait (%p1148_p8), %s198_s8, 128  }
  0x65   : > { %764 = vsyncadd (%p1148_p8), %s198_s8, 4294967168  ;;  %p1149_p6 = scmp.ne.s32.totalorder %s1137_s23, 0 }
  0x67   : > { %766 = dma.done.wait (%p1149_p6), [#allocation6], 256  }
  0x68   : > { %768 = vsyncadd (%p1149_p6), [#allocation6], 4294967040  ;;  %s484_s19 = sshll.u32 %s803_s18, 3  ;;  %v243_v0 = vlaneseq  ;;  %v817_v1 = vmov 0.0   ;;  %vm818_vm0 = vmmov 0   ;;  %s1017_s27 = sand.u32 1, %s783_s13  }
  0x69   : > { %495 = vmatprep.subr.bf16.mxu0 %v817_v1  ;;  %499 = vmatprep.mubr.msk.bf16.mxu0 %vm818_vm0, %v817_v1  ;;  %v245_v2 = vstv %s484_s19  ;;  %s1020_s24 = scalar_lea.vmem [#allocation7], %s1017_s27  ;;  %v609_v5 = vld [vmem:[#allocation5] sm:$0xff]   ;;  %v610_v6 = vld [vmem:[#allocation5 + $0x8] sm:$0xff]   ;;  %v248_v7 = vld [vmem:[%s201_s7] sm:$0xff]  ;;  %vm269_vm2 = vcmask 261120   ;;  %s1024_s23 = scalar_lea.vmem [#allocation8], %s1017_s27 }
  0x6a   : > { %v244_v3 = vshrl.u32 %v243_v0, 7  ;;  %239 = vst [vmem:[%s1020_s24] sm:$0x1] %v817_v1  ;;  %496 = vmatpush3.bf16.msra.mxu0 %v609_v5  ;;  %240 = vst [vmem:[%s1024_s23] sm:$0x1] %v817_v1  ;;  %s488_s4 = sshll.u32 %s803_s18, 4  ;;  %s349_s29 = sshll.u32 %s1020_s24, 4  ;;  %s1037_s29 = int_to_ptr.vmem [resolvable:$true] %s349_s29 }
  0x6b   : > { %497 = vmatprep.subr.bf16.mxu0 %v817_v1  ;;  %s362_s5 = sshll.u32 %s1024_s23, 4  ;;  %s1035_s10 = scalar_lea.hbm %s1126_s2, %s488_s4  ;;  %s1045_s5 = int_to_ptr.vmem [resolvable:$true] %s362_s5 }
  0x6c   : > { %v246_v4 = vadd.s32 %v245_v2, %v244_v3  ;;  %s1043_s28 = scalar_lea.hbm %s1127_s3, %s488_s4  ;;  %s333_s30 = scalar_lea.sflag [#allocation4], %s1017_s27 }
  0x6d   : > { %s669_s6 = scalar_lea.vmem %s1037_s29, 16  ;;  %p1150_p10 = scmp.ne.s32.totalorder %s1139_s25, 0 }
  0x6e   : > { %vm247_vm1 = vcmp.lt.s32.totalorder %v246_v4, 16  ;;  %498 = vmatpush3.bf16.msra.mxu0 %v610_v6  ;;  %p670_p5 = scmp.ne.s32.totalorder %s1037_s29, %s669_s6  ;;  %s819_s1 = smov [#allocation7]  }
  0x6f   : > { %v251_v8 = vsel %vm247_vm1, %v248_v7, 0.0  ;;  %s673_s8 = sshll.u32 %s819_s1, 4  ;;  %s674_s8 = int_to_ptr.vmem [resolvable:$false] %s673_s8 }
  0x70   : > { %v252_v9 = vpack.c.bf16 %v251_v8, %v251_v8  ;;  %p671_p11 = pnand %p670_p5, %p1150_p10  ;;  %s675_s7 = scalar_lea.vmem %s674_s8, 32 }
  0x71   : > { %v313_v24 = vld [vmem:[%s1020_s24] sm:$0x1]  ;;  %p676_p0 = scmp.lt.s32.totalorder %s1037_s29, %s674_s8  ;;  %p677_p2 = scmp.lt.s32.totalorder %s675_s7, %s669_s6 }
  0x72   : > { %500 = vmatmul.mubr.msk.bf16.vlgmr.msra.gmra.mrb[0].mxu0 %vm269_vm2, %v252_v9  ;;  %v322_v27 = vld [vmem:[%s1024_s23] sm:$0x1]  ;;  %p672_p13 = pneg %p671_p11 }
  0x73   : > { %p678_p3 = por %p677_p2, %p676_p0 }
  0x75   : > { %p679_p7 = pnand %p678_p3, %p672_p13 }
 0x145   : > { %v307_v10 = vpop.f32.mrb[0].mxu0 }
 0x146   : > { %v314_v11 = vrot.slane %v307_v10, 4  ;;  %v323_v12 = vmul.f32 %v307_v10, %v307_v10  ;;  %v501_v13 = vpop.f32.mrb[1].mxu0 }
 0x147   : > { %v310_v14 = vpop.f32.mrb[2].mxu0 }
 0x148   : > { %v315_v15 = vadd.f32 %v314_v11, %v307_v10  ;;  %v324_v16 = vrot.slane %v323_v12, 4  ;;  %v502_v17 = vpop.f32.mrb[3].mxu0 }
 0x14a   : > { %v316_v18 = vrot.slane %v315_v15, 2  ;;  %v325_v19 = vadd.f32 %v324_v16, %v323_v12 }
 0x14c   : > { %v317_v20 = vadd.f32 %v316_v18, %v315_v15  ;;  %v326_v21 = vrot.slane %v325_v19, 2 }
 0x14e   : > { %v318_v22 = vrot.slane %v317_v20, 1  ;;  %v327_v23 = vadd.f32 %v326_v21, %v325_v19 }
 0x150   : > { %v319_v25 = vadd.f32 %v318_v22, %v317_v20  ;;  %v328_v26 = vrot.slane %v327_v23, 1 }
 0x152   : > { %v320_v28 = vadd.f32 %v319_v25, %v313_v24  ;;  %v329_v29 = vadd.f32 %v328_v26, %v327_v23 }
 0x154   : > { %321 = vst [vmem:[%s1020_s24] sm:$0x1] %v320_v28  ;;  %v330_v30 = vadd.f32 %v329_v29, %v322_v27 }
 0x155   : > { %682 = shalt.err (!%p679_p7)
}
 0x156   : > { %s683_s19 = scalar_lea.hbm %s1035_s10, 16  ;;  %s687_s9 = scalar_lea.hbm %s1126_s2, 32 }
 0x157   : > { %p684_p9 = scmp.ne.s32.totalorder %s1035_s10, %s683_s19  ;;  %p688_p12 = scmp.lt.u32.totalorder %s1035_s10, %s1126_s2 }
 0x158   : > { %p689_p8 = scmp.lt.u32.totalorder %s687_s9, %s683_s19  ;;  %p691_p5 = scmp.lt.u32.totalorder %s683_s19, %s1035_s10 }
 0x159   : > { %p685_p1 = pnand %p684_p9, %p1150_p10 }
 0x15a   : > { %p690_p6 = por %p689_p8, %p688_p12 }
 0x15b   : > { %p686_p4 = pneg %p685_p1 }
 0x15c   : > { %p692_p11 = por %p691_p5, %p690_p6 }
 0x15e   : > { %p693_p13 = pnand %p692_p11, %p686_p4 }
 0x160   : > { %696 = shalt.err (!%p693_p13)
}
 0x161   : > { %509 = dma.vmem_to_hbm [thread:$0]  (%p1150_p10), %s1037_s29, 16, %s1035_s10, %s333_s30   ;;  %331 = vst [vmem:[%s1024_s23] sm:$0x1] %v330_v30 }
 0x162   : > { %s337_s22 = scalar_lea.sflag [#allocation9], %s1017_s27  ;;  %s697_s6 = scalar_lea.vmem %s1045_s5, 16 }
 0x163   : > { %p698_p0 = scmp.ne.s32.totalorder %s1045_s5, %s697_s6  ;;  %s820_s1 = smov [#allocation8]  }
 0x164   : > { %s701_s8 = sshll.u32 %s820_s1, 4  ;;  %s702_s8 = int_to_ptr.vmem [resolvable:$false] %s701_s8 }
 0x165   : > { %p699_p2 = pnand %p698_p0, %p1150_p10  ;;  %s703_s7 = scalar_lea.vmem %s702_s8, 32 }
 0x166   : > { %p704_p7 = scmp.lt.s32.totalorder %s1045_s5, %s702_s8  ;;  %p705_p9 = scmp.lt.s32.totalorder %s703_s7, %s697_s6 }
 0x167   : > { %p700_p3 = pneg %p699_p2 }
 0x168   : > { %p706_p1 = por %p705_p9, %p704_p7 }
 0x16a   : > { %p707_p4 = pnand %p706_p1, %p700_p3 }
 0x16c   : > { %710 = shalt.err (!%p707_p4)
}
 0x16d   : > { %s711_s27 = scalar_lea.hbm %s1043_s28, 16  ;;  %s715_s10 = scalar_lea.hbm %s1127_s3, 32 }
 0x16e   : > { %p712_p12 = scmp.ne.s32.totalorder %s1043_s28, %s711_s27  ;;  %p716_p5 = scmp.lt.u32.totalorder %s1043_s28, %s1127_s3 }
 0x16f   : > { %p717_p11 = scmp.lt.u32.totalorder %s715_s10, %s711_s27  ;;  %p719_p0 = scmp.lt.u32.totalorder %s711_s27, %s1043_s28 }
 0x170   : > { %p713_p8 = pnand %p712_p12, %p1150_p10 }
 0x171   : > { %p718_p13 = por %p717_p11, %p716_p5 }
 0x172   : > { %p714_p6 = pneg %p713_p8 }
 0x173   : > { %p720_p2 = por %p719_p0, %p718_p13 }
 0x175   : > { %p721_p3 = pnand %p720_p2, %p714_p6 }
 0x177   : > { %724 = shalt.err (!%p721_p3)
}
 0x178   : > { %510 = dma.vmem_to_hbm [thread:$0]  (%p1150_p10), %s1045_s5, 16, %s1043_s28, %s337_s22  }
 0x179 PF: > { %s374_s24 = sand.u32 1, %s779_s12   ;;  %p1151_p7 = scmp.ne.s32.totalorder %s1140_s26, 0 }
 0x17a   : > { %p1152_p9 = scmp.ge.s32.totalorder %s811_s20, 2  ;;  %s375_s4 = scalar_lea.sflag [#allocation4], %s374_s24 }
 0x17c   : > { %p522_p1 = pnand %p1152_p9, %p1151_p7 }
 0x17e   : > { %770 = dma.done.wait (!%p522_p1), %s375_s4, 16  }
 0x17f   : > { %772 = vsyncadd (!%p522_p1), %s375_s4, 4294967280  ;;  %s383_s9 = scalar_lea.sflag [#allocation9], %s374_s24 }
 0x180   : > { %774 = dma.done.wait (!%p522_p1), %s383_s9, 16  }
 0x181   : > { %776 = vsyncadd (!%p522_p1), %s383_s9, 4294967280  ;;  %s24_s20 = sadd.s32 1, %s811_s20   ;;  %s1153_s25 = smov %s964_s15 }
 0x182   : > { %p21_p4 = scmp.ge.s32.totalorder %s24_s20, 4   ;;  %s1154_s18 = sld [smem:[#allocation14_spill]] }
 0x183   : > { %s1155_s19 = sld [smem:[#allocation15_spill]]  ;;  %s1156_s12 = smov %s783_s13 }
 0x184   : > { %s1157_s13 = smov %s787_s14  ;;  %s1158_s14 = smov %s961_s11 }
 0x185   : > { %s1159_s15 = smov %s795_s16  ;;  %s1160_s16 = smov %s799_s17 }
 0x186   : > { %s1161_s17 = smov %s1153_s25  ;;  %23 = sbr.rel (!%p21_p4) target bundleno = 13 (0xd), region = 98 }
 0x18d   :  { %387 = vsyncpa [#allocation3], 1 }
 0x18e   :  { %389 = vsyncpa [#allocation3 + $0x1], 1 }
 0x18f   :  { %390 = vsyncpa [#allocation6], 1 }
 0x190   :  { %391 = vsyncpa [#allocation4], 1 }
 0x191   :  { %393 = vsyncpa [#allocation4 + $0x1], 1 }
 0x192   :  { %394 = vsyncpa [#allocation9], 1 }
 0x193   :  { %396 = vsyncpa [#allocation9 + $0x1], 1 }

</bundles_post_ra>
